<compile_context>
chip_gen: v7x
topology: tpu7x:2x2x1
jax: 0.10.0
libtpu: 0.0.40
codegen_flags: <defaults>
</compile_context>

<pallas_src>
import math
from functools import partial

import jax
import jax.numpy as jnp
from jax.experimental import pallas as pl
from jax.experimental.pallas import tpu as pltpu

LATENT_DIM = 64            # feature width of each linear layer
PACK = 2                   # batch rows packed per lane-dense row
WIDE = LATENT_DIM * PACK   # 128: full vreg lane width
DEFAULT_TILE_ROWS = 8192   # max packed rows per grid step (4 MiB/tile in f32)


def _round8(n):
    return ((n + 7) // 8) * 8


def _mlp_kernel(x_ref, w_ref, b_ref, o_ref, *, compute_dtype):
    # x_ref: (TB, 128)  two batch rows packed per lane-dense row
    # w_ref: (2, 128, 128) block-diagonal [[W,0],[0,W]] per layer (resident)
    # b_ref: (2, 1, 128)   [b, b] per layer (resident)
    x = x_ref[...]
    w0 = w_ref[0]
    w1 = w_ref[1]
    if compute_dtype != jnp.float32:
        x = x.astype(compute_dtype)
        w0 = w0.astype(compute_dtype)
        w1 = w1.astype(compute_dtype)
    h = jnp.tanh(
        jnp.dot(x, w0, preferred_element_type=jnp.float32) + b_ref[0]
    )
    if compute_dtype != jnp.float32:
        h = h.astype(compute_dtype)
    o_ref[...] = jnp.tanh(
        jnp.dot(h, w1, preferred_element_type=jnp.float32) + b_ref[1]
    )


def _pack_params(w1, b1, w2, b2):
    """w*: (64,64) in (in,out) layout, b*: (64,) -> (2,128,128), (2,1,128)."""
    z = jnp.zeros((LATENT_DIM, LATENT_DIM), jnp.float32)
    w1_bd = jnp.block([[w1, z], [z, w1]])                 # (128,128)
    w2_bd = jnp.block([[w2, z], [z, w2]])                 # (128,128)
    w_packed = jnp.stack([w1_bd, w2_bd]).astype(jnp.float32)          # (2,128,128)
    b_packed = jnp.stack(
        [jnp.concatenate([b1, b1]), jnp.concatenate([b2, b2])]
    ).reshape(2, 1, WIDE).astype(jnp.float32)                         # (2,1,128)
    return w_packed, b_packed


def human_prob_forward(x_flat, w1, b1, w2, b2, *,
                       tile_rows=DEFAULT_TILE_ROWS, use_bf16_matmul=False):
    """x_flat: (B, 64) f32; w*: (64, 64) f32 stored (in, out); b*: (64,) f32."""
    B, D = x_flat.shape
    assert D == LATENT_DIM
    x_flat = x_flat.astype(jnp.float32)

    # ---- wrapper-side layout plumbing: lane-dense 128-wide HBM slab ---------
    # Pad by at most ONE row (only when B is odd) so the (B,64)->(B/2,128)
    # reshape is a free contiguous view.  No padding to a tile multiple.
    if B % PACK:
        x_flat = jnp.pad(x_flat, ((0, 1), (0, 0)))
    packed_rows = x_flat.shape[0] // PACK
    x_wide = x_flat.reshape(packed_rows, WIDE)

    # Tile policy: big tiles to amortize per-step overhead, but keep >= ~4 grid
    # steps so the second v7x TensorCore gets work; floor of 256 rows.
    tb = _round8(max(256, min(tile_rows, pl.cdiv(packed_rows, 4))))
    tb = min(tb, _round8(packed_rows))
    grid = (pl.cdiv(packed_rows, tb),)     # ragged last block handled by Pallas

    w_packed, b_packed = _pack_params(w1, b1, w2, b2)

    cost = pl.CostEstimate(
        flops=2 * 2 * packed_rows * WIDE * WIDE,           # 2 layers of matmul
        transcendentals=2 * packed_rows * WIDE,            # 2 tanh passes
        bytes_accessed=4 * (2 * packed_rows * WIDE + 2 * WIDE * WIDE + 2 * WIDE),
    )

    compute_dtype = jnp.bfloat16 if use_bf16_matmul else jnp.float32
    kernel = partial(_mlp_kernel, compute_dtype=compute_dtype)

    out_wide = pl.pallas_call(
        kernel,
        out_shape=jax.ShapeDtypeStruct((packed_rows, WIDE), jnp.float32),
        grid=grid,
        in_specs=[
            pl.BlockSpec((tb, WIDE), lambda i: (i, 0)),            # x batch tile
            # Constant block index -> Pallas skips the re-DMA between steps;
            # weights/biases stay resident in VMEM for the whole grid.
            pl.BlockSpec((2, WIDE, WIDE), lambda i: (0, 0, 0)),    # weights
            pl.BlockSpec((2, 1, WIDE), lambda i: (0, 0, 0)),       # biases
        ],
        out_specs=pl.BlockSpec((tb, WIDE), lambda i: (i, 0)),
        compiler_params=pltpu.CompilerParams(
            dimension_semantics=("parallel",),
            vmem_limit_bytes=32 << 20,   # v5e scoped default is only 16 MiB
        ),
        cost_estimate=cost,
    )(x_wide, w_packed, b_packed)

    # Un-pack: (packed, 128) -> (2*packed, 64); drop the single pad row if any.
    out = out_wide.reshape(packed_rows * PACK, LATENT_DIM)
    if out.shape[0] != B:
        out = out[:B]
    return out


def xavier_uniform(key, fan_in, fan_out):
    # Matches nn.init.xavier_uniform_ (gain=1.0) for a (fan_out, fan_in) weight;
    # emitted directly in (fan_in, fan_out) layout for x @ W.
    bound = math.sqrt(6.0 / (fan_in + fan_out))
    return jax.random.uniform(
        key, (fan_in, fan_out), dtype=jnp.float32, minval=-bound, maxval=bound
    )


if __name__ == "__main__":
    key = jax.random.PRNGKey(0)
    k_x, k_w1, k_w2 = jax.random.split(key, 3)

    # Small input whose flattened feature dim is 64 (e.g. (B, 8, 8) -> (B, 64)).
    B = 8
    inputs = jax.random.normal(k_x, (B, 8, 8), dtype=jnp.float32)

    # Deterministic parameter init: xavier_uniform weights, zero biases.
    w1 = xavier_uniform(k_w1, LATENT_DIM, LATENT_DIM)
    b1 = jnp.zeros((LATENT_DIM,), dtype=jnp.float32)
    w2 = xavier_uniform(k_w2, LATENT_DIM, LATENT_DIM)
    b2 = jnp.zeros((LATENT_DIM,), dtype=jnp.float32)

    x_flat = inputs.reshape(B, -1)  # nn.Flatten

    out = human_prob_forward(x_flat, w1, b1, w2, b2)
    out = jax.block_until_ready(out)

    # Pure-JAX reference check.
    ref = jnp.tanh(jnp.tanh(x_flat @ w1 + b1[None, :]) @ w2 + b2[None, :])
    assert out.shape == (B, LATENT_DIM)
    assert jnp.allclose(out, ref, atol=1e-5, rtol=1e-5)

    # Also exercise an odd batch (single-row pad path + ragged last block).
    B2 = 21
    x2 = jax.random.normal(jax.random.PRNGKey(1), (B2, LATENT_DIM), jnp.float32)
    out2 = jax.block_until_ready(human_prob_forward(x2, w1, b1, w2, b2))
    ref2 = jnp.tanh(jnp.tanh(x2 @ w1 + b1[None, :]) @ w2 + b2[None, :])
    assert out2.shape == (B2, LATENT_DIM)
    assert jnp.allclose(out2, ref2, atol=1e-5, rtol=1e-5)

    print("KERNEL_OK")
</pallas_src>

<mosaic_0001>
module attributes {stable_mosaic.version = 11 : i64} {
  func.func @_mlp_kernel(%arg0: i32, %arg1: memref<8x128xf32, #tpu.memory_space<vmem>>, %arg2: memref<2x128x128xf32, #tpu.memory_space<vmem>>, %arg3: memref<2x1x128xf32, #tpu.memory_space<vmem>>, %arg4: memref<8x128xf32, #tpu.memory_space<vmem>>) attributes {dimension_semantics = [#tpu.dimension_semantics<parallel>], iteration_bounds = array<i64: 1>, scalar_prefetch = 0 : i64, scratch_operands = 0 : i64, tpu.core_type = #tpu.core_type<tc>, window_params = [{transform_indices = @transform_0, window_bounds = array<i64: 8, 128>}, {pipeline_mode = #tpu.pipeline_mode<synchronous>, transform_indices = @transform_1, window_bounds = array<i64: 2, 128, 128>}, {pipeline_mode = #tpu.pipeline_mode<synchronous>, transform_indices = @transform_2, window_bounds = array<i64: 2, 1, 128>}, {transform_indices = @transform_3, window_bounds = array<i64: 8, 128>}]} {
    %c0 = arith.constant 0 : index
    %c0_0 = arith.constant 0 : index
    %0 = vector.load %arg1[%c0, %c0_0] : memref<8x128xf32, #tpu.memory_space<vmem>>, vector<8x128xf32>
    %c0_1 = arith.constant 0 : index
    %c0_2 = arith.constant 0 : index
    %c0_3 = arith.constant 0 : index
    %1 = vector.load %arg2[%c0_1, %c0_2, %c0_3] : memref<2x128x128xf32, #tpu.memory_space<vmem>>, vector<1x128x128xf32>
    %2 = vector.shape_cast %1 : vector<1x128x128xf32> to vector<128x128xf32>
    %c1 = arith.constant 1 : index
    %c0_4 = arith.constant 0 : index
    %c0_5 = arith.constant 0 : index
    %3 = vector.load %arg2[%c1, %c0_4, %c0_5] : memref<2x128x128xf32, #tpu.memory_space<vmem>>, vector<1x128x128xf32>
    %4 = vector.shape_cast %3 : vector<1x128x128xf32> to vector<128x128xf32>
    %cst = arith.constant dense<0.000000e+00> : vector<8x128xf32>
    %5 = tpu.matmul %0, %2, %cst {dimension_numbers = #tpu.dot_dimension_numbers<[1], [0], [0], [1], [0, 0, 1, 1], [], []>} : vector<8x128xf32>, vector<128x128xf32>, vector<8x128xf32> -> vector<8x128xf32>
    %c0_6 = arith.constant 0 : index
    %c0_7 = arith.constant 0 : index
    %c0_8 = arith.constant 0 : index
    %6 = vector.load %arg3[%c0_6, %c0_7, %c0_8] : memref<2x1x128xf32, #tpu.memory_space<vmem>>, vector<1x1x128xf32>
    %7 = vector.shape_cast %6 : vector<1x1x128xf32> to vector<1x128xf32>
    %8 = vector.broadcast %7 : vector<1x128xf32> to vector<8x128xf32>
    %9 = arith.addf %5, %8 : vector<8x128xf32>
    %10 = math.tanh %9 : vector<8x128xf32>
    %cst_9 = arith.constant dense<0.000000e+00> : vector<8x128xf32>
    %11 = tpu.matmul %10, %4, %cst_9 {dimension_numbers = #tpu.dot_dimension_numbers<[1], [0], [0], [1], [0, 0, 1, 1], [], []>} : vector<8x128xf32>, vector<128x128xf32>, vector<8x128xf32> -> vector<8x128xf32>
    %c1_10 = arith.constant 1 : index
    %c0_11 = arith.constant 0 : index
    %c0_12 = arith.constant 0 : index
    %12 = vector.load %arg3[%c1_10, %c0_11, %c0_12] : memref<2x1x128xf32, #tpu.memory_space<vmem>>, vector<1x1x128xf32>
    %13 = vector.shape_cast %12 : vector<1x1x128xf32> to vector<1x128xf32>
    %14 = vector.broadcast %13 : vector<1x128xf32> to vector<8x128xf32>
    %15 = arith.addf %11, %14 : vector<8x128xf32>
    %16 = math.tanh %15 : vector<8x128xf32>
    %c0_13 = arith.constant 0 : index
    %c0_14 = arith.constant 0 : index
    %17 = vector.load %arg4[%c0_13, %c0_14] : memref<8x128xf32, #tpu.memory_space<vmem>>, vector<8x128xf32>
    tpu.vector_store %arg4[%c0_13, %c0_14], %16 {strides = array<i32>} : memref<8x128xf32, #tpu.memory_space<vmem>>, vector<8x128xf32>,
    return
  }
  func.func @transform_0(%arg0: i32) -> (i32, i32) {
    %c0_i32 = arith.constant 0 : i32
    %c0_i32_0 = arith.constant 0 : i32
    return %arg0, %c0_i32 : i32, i32
  }
  func.func @transform_1(%arg0: i32) -> (i32, i32, i32) {
    %c0_i32 = arith.constant 0 : i32
    %c0_i32_0 = arith.constant 0 : i32
    %c0_i32_1 = arith.constant 0 : i32
    %c0_i32_2 = arith.constant 0 : i32
    return %c0_i32, %c0_i32_0, %c0_i32_1 : i32, i32, i32
  }
  func.func @transform_2(%arg0: i32) -> (i32, i32, i32) {
    %c0_i32 = arith.constant 0 : i32
    %c0_i32_0 = arith.constant 0 : i32
    %c0_i32_1 = arith.constant 0 : i32
    %c0_i32_2 = arith.constant 0 : i32
    return %c0_i32, %c0_i32_0, %c0_i32_1 : i32, i32, i32
  }
  func.func @transform_3(%arg0: i32) -> (i32, i32) {
    %c0_i32 = arith.constant 0 : i32
    %c0_i32_0 = arith.constant 0 : i32
    return %arg0, %c0_i32 : i32, i32
  }
}

</mosaic_0001>

<bundles_post_ra>
// kernel: tpu_custom_call.1
= control target key start
LH: loop header
LB: loop body
LE: loop exit
PB: predicated region body
PF: predicated region fallthrough
CT: control target
= control target key end

     0   :  { %8 = vsyncpa [#allocation3], 0  ;;  %s588_s0 = inlined_call_operand.hbm [shape: f32[4,128], index: 0, kind: input, shape index: {}]   ;;  %s589_s1 = inlined_call_operand.hbm [shape: f32[2,128,128], index: 1, kind: input, shape index: {}]   ;;  %s590_s2 = inlined_call_operand.vmem [shape: f32[2,1,128], index: 2, kind: input, shape index: {}]   ;;  %s591_s3 = inlined_call_operand.hbm [shape: f32[4,128], index: 3, kind: output, shape index: {}]  }
   0x1   :  { %9 = vsyncpa [#allocation6], 0 }
   0x2   :  { %10 = vsyncpa [#allocation4], 0 }
   0x3   :  { %15 = vsyncadd [#allocation3], 64  ;;  %s494_s12 = smov [#allocation2]   ;;  %s422_s16 = scalar_lea.hbm %s588_s0, 64 }
   0x4   :  { %s16_s13 = sshll.u32 %s494_s12, 4  ;;  %p423_p0 = scmp.ne.s32.totalorder %s588_s0, %s422_s16  ;;  %s17_s13 = int_to_ptr.vmem [resolvable:$true] %s16_s13 }
   0x5   :  { %p426_p1 = scmp.lt.u32.totalorder %s422_s16, %s588_s0 }
   0x7   :  { %p428_p2 = pnand %p426_p1, %p423_p0 }
   0x9   :  { %431 = shalt.err (!%p428_p2)
}
   0xa   :  { %s432_s21 = scalar_lea.vmem %s17_s13, 64  ;;  %s436_s22 = scalar_lea.vmem %s17_s13, 128 }
   0xb   :  { %p433_p3 = scmp.ne.s32.totalorder %s17_s13, %s432_s21  ;;  %p437_p4 = scmp.lt.s32.totalorder %s17_s13, %s17_s13 }
   0xc   :  { %p438_p5 = scmp.lt.s32.totalorder %s436_s22, %s432_s21 }
   0xe   :  { %p439_p6 = por %p438_p5, %p437_p4 }
  0x10   :  { %p440_p7 = pnand %p439_p6, %p433_p3 }
  0x12   :  { %443 = shalt.err (!%p440_p7)
}
  0x13   :  { %s495_s23 = smov 64   ;;  %s496_s24 = smov 4  }
  0x14   :  { %22 = dma.hbm_to_vmem [thread:$0]  %s588_s0, 64, %s17_s13, [#allocation3], %s495_s23, %s495_s23, %s496_s24  }
  0x15   :  { %s497_s27 = smov [#allocation5]   ;;  %s444_s4 = scalar_lea.hbm %s589_s1, 4096 }
  0x16   :  { %s28_s28 = sshll.u32 %s497_s27, 4  ;;  %p445_p8 = scmp.ne.s32.totalorder %s589_s1, %s444_s4  ;;  %s29_s28 = int_to_ptr.vmem [resolvable:$true] %s28_s28 }
  0x17   :  { %p448_p9 = scmp.lt.u32.totalorder %s444_s4, %s589_s1 }
  0x19   :  { %p450_p10 = pnand %p448_p9, %p445_p8 }
  0x1b   :  { %453 = shalt.err (!%p450_p10)
}
  0x1c   :  { %s454_s9 = scalar_lea.vmem %s29_s28, 4096  ;;  %p459_p12 = scmp.lt.s32.totalorder %s29_s28, %s29_s28 }
  0x1d   :  { %p455_p11 = scmp.ne.s32.totalorder %s29_s28, %s454_s9  ;;  %p460_p13 = scmp.lt.s32.totalorder %s454_s9, %s454_s9 }
  0x1f   :  { %p461_p0 = por %p460_p13, %p459_p12 }
  0x21   :  { %p462_p1 = pnand %p461_p0, %p455_p11 }
  0x23   :  { %465 = shalt.err (!%p462_p1)
}
  0x24   :  { %s498_s0 = smov 128   ;;  %s499_s10 = smov 8  }
  0x25   :  { %34 = dma.hbm_to_vmem [thread:$0]  %s589_s1, 4096, %s29_s28, [#allocation6], %s498_s0, %s498_s0, %s499_s10  }
  0x26   :  { %488 = dma.done.wait [#allocation3], 128  }
  0x27   :  { %489 = vsyncadd [#allocation3], 4294967168 }
  0x28   :  { %490 = dma.done.wait [#allocation6], 4096  }
  0x29   :  { %491 = vsyncadd [#allocation6], 4294963200  ;;  %v500_v0 = vmov 0.0|0.0   ;;  %vm501_vm0 = vmmov 0   ;;  %v502_v1 = vmov 0.0   ;;  %v44_v2 = vld [vmem:[#allocation5] sm:$0xff] }
  0x2a   :  { %360 = vmatprep.subr.bf16.mxu0 %v500_v0  ;;  %322 = vmatprep.mubr.msk.f32.mxu0 %vm501_vm0, %v502_v1  ;;  %v45_v3 = vld [vmem:[#allocation5 + $0x8] sm:$0xff]  ;;  %v46_v4 = vld [vmem:[#allocation5 + $0x10] sm:$0xff]  ;;  %v47_v6 = vld [vmem:[#allocation5 + $0x18] sm:$0xff] }
  0x2b   :  { %384 = vmatprep.subr.bf16.mxu1 %v500_v0  ;;  %357 = vmatprep.mubr.msk.f32.mxu1 %vm501_vm0, %v502_v1  ;;  %v361_v5 = vpack.c.bf16 %v45_v3, %v44_v2  ;;  %v364_v7 = vpack.c.bf16 %v47_v6, %v46_v4  ;;  %v48_v8 = vld [vmem:[#allocation5 + $0x20] sm:$0xff]  ;;  %v49_v9 = vld [vmem:[#allocation5 + $0x28] sm:$0xff]  ;;  %v63_v12 = vld [vmem:[#allocation5 + $0x90] sm:$0xff] }
  0x2c   :  { %v61_v10 = vld [vmem:[#allocation5 + $0x80] sm:$0xff]  ;;  %v62_v11 = vld [vmem:[#allocation5 + $0x88] sm:$0xff]  ;;  %v64_v13 = vld [vmem:[#allocation5 + $0x98] sm:$0xff]  ;;  %v367_v14 = vpack.c.bf16 %v49_v9, %v48_v8 }
  0x2d   :  { %362 = vmatpush3.bf16.msra.mxu0 %v361_v5  ;;  %v385_v15 = vpack.c.bf16 %v62_v11, %v61_v10  ;;  %v50_v16 = vld [vmem:[#allocation5 + $0x30] sm:$0xff]  ;;  %v51_v17 = vld [vmem:[#allocation5 + $0x38] sm:$0xff]  ;;  %v388_v18 = vpack.c.bf16 %v64_v13, %v63_v12  ;;  %v65_v19 = vld [vmem:[#allocation5 + $0xa0] sm:$0xff] }
  0x2e   :  { %363 = vmatprep.subr.bf16.mxu0 %v500_v0  ;;  %v66_v20 = vld [vmem:[#allocation5 + $0xa8] sm:$0xff]  ;;  %v370_v21 = vpack.c.bf16 %v51_v17, %v50_v16  ;;  %v52_v22 = vld [vmem:[#allocation5 + $0x40] sm:$0xff]  ;;  %v67_v25 = vld [vmem:[#allocation5 + $0xb0] sm:$0xff] }
  0x2f   :  { %386 = vmatpush3.bf16.msra.mxu1 %v385_v15  ;;  %v53_v23 = vld [vmem:[#allocation5 + $0x48] sm:$0xff]  ;;  %v391_v24 = vpack.c.bf16 %v66_v20, %v65_v19  ;;  %v68_v26 = vld [vmem:[#allocation5 + $0xb8] sm:$0xff]  ;;  %v54_v28 = vld [vmem:[#allocation5 + $0x50] sm:$0xff] }
  0x30   :  { %387 = vmatprep.subr.bf16.mxu1 %v500_v0  ;;  %v373_v27 = vpack.c.bf16 %v53_v23, %v52_v22  ;;  %v55_v29 = vld [vmem:[#allocation5 + $0x58] sm:$0xff]  ;;  %v394_v30 = vpack.c.bf16 %v68_v26, %v67_v25  ;;  %v69_v31 = vld [vmem:[#allocation5 + $0xc0] sm:$0xff]  ;;  %v70_v32 = vld [vmem:[#allocation5 + $0xc8] sm:$0xff] }
  0x31   :  { %365 = vmatpush3.bf16.msra.mxu0 %v364_v7  ;;  %v376_v33 = vpack.c.bf16 %v55_v29, %v54_v28  ;;  %v56_v34 = vld [vmem:[#allocation5 + $0x60] sm:$0xff]  ;;  %v57_v35 = vld [vmem:[#allocation5 + $0x68] sm:$0xff]  ;;  %v397_v36 = vpack.c.bf16 %v70_v32, %v69_v31  ;;  %v58_v38 = vld [vmem:[#allocation5 + $0x70] sm:$0xff] }
  0x32   :  { %366 = vmatprep.subr.bf16.mxu0 %v500_v0  ;;  %v379_v37 = vpack.c.bf16 %v57_v35, %v56_v34  ;;  %v59_v39 = vld [vmem:[#allocation5 + $0x78] sm:$0xff]  ;;  %v71_v42 = vld [vmem:[#allocation5 + $0xd0] sm:$0xff]  ;;  %v73_v45 = vld [vmem:[#allocation5 + $0xe0] sm:$0xff] }
  0x33   :  { %389 = vmatpush3.bf16.msra.mxu1 %v388_v18  ;;  %v382_v40 = vpack.c.bf16 %v59_v39, %v58_v38  ;;  %v43_v41 = vld [vmem:[#allocation2] sm:$0xff]  ;;  %v74_v46 = vld [vmem:[#allocation5 + $0xe8] sm:$0xff]  ;;  %v75_v48 = vld [vmem:[#allocation5 + $0xf0] sm:$0xff] }
  0x34   :  { %390 = vmatprep.subr.bf16.mxu1 %v500_v0  ;;  %v72_v43 = vld [vmem:[#allocation5 + $0xd8] sm:$0xff]  ;;  %v403_v47 = vpack.c.bf16 %v74_v46, %v73_v45 }
  0x35   :  { %368 = vmatpush3.bf16.msra.mxu0 %v367_v14  ;;  %v400_v44 = vpack.c.bf16 %v72_v43, %v71_v42  ;;  %v76_v49 = vld [vmem:[#allocation5 + $0xf8] sm:$0xff] }
  0x36   :  { %369 = vmatprep.subr.bf16.mxu0 %v500_v0  ;;  %v406_v50 = vpack.c.bf16 %v76_v49, %v75_v48  ;;  %v253_v51 = vld [vmem:[%s590_s2] ss:$0 sm:$0xff]  ;;  %v255_v56 = vld [vmem:[%s590_s2 + $0x1] ss:$0 sm:$0xff] }
  0x37   :  { %392 = vmatpush3.bf16.msra.mxu1 %v391_v24 }
  0x38   :  { %393 = vmatprep.subr.bf16.mxu1 %v500_v0 }
  0x39   :  { %371 = vmatpush3.bf16.msra.mxu0 %v370_v21 }
  0x3a   :  { %372 = vmatprep.subr.bf16.mxu0 %v500_v0 }
  0x3b   :  { %395 = vmatpush3.bf16.msra.mxu1 %v394_v30 }
  0x3c   :  { %396 = vmatprep.subr.bf16.mxu1 %v500_v0 }
  0x3d   :  { %374 = vmatpush3.bf16.msra.mxu0 %v373_v27 }
  0x3e   :  { %375 = vmatprep.subr.bf16.mxu0 %v500_v0 }
  0x3f   :  { %398 = vmatpush3.bf16.msra.mxu1 %v397_v36 }
  0x40   :  { %399 = vmatprep.subr.bf16.mxu1 %v500_v0 }
  0x41   :  { %377 = vmatpush3.bf16.msra.mxu0 %v376_v33 }
  0x42   :  { %378 = vmatprep.subr.bf16.mxu0 %v500_v0 }
  0x43   :  { %401 = vmatpush3.bf16.msra.mxu1 %v400_v44 }
  0x44   :  { %402 = vmatprep.subr.bf16.mxu1 %v500_v0 }
  0x45   :  { %380 = vmatpush3.bf16.msra.mxu0 %v379_v37 }
  0x46   :  { %381 = vmatprep.subr.bf16.mxu0 %v500_v0 }
  0x47   :  { %404 = vmatpush3.bf16.msra.mxu1 %v403_v47 }
  0x48   :  { %405 = vmatprep.subr.bf16.mxu1 %v500_v0 }
  0x49   :  { %383 = vmatpush3.bf16.msra.mxu0 %v382_v40 }
  0x4b   :  { %407 = vmatpush3.bf16.msra.mxu1 %v406_v50 }
  0x4c   :  { %323 = vmatmul.mubr.f32.vlgmr.msra.gmra.mrb[0].mxu0 %v43_v41 }
 0x11f   :  { %v150_v52 = vpop.f32.mrb[0].mxu0 }
 0x120   :  { %v151_v53 = vadd.f32 %v253_v51, %v150_v52  ;;  %v324_v54 = vpop.f32.mrb[1].mxu0 }
 0x122   :  { %418 = vtanh.f32 %v151_v53 }
 0x12c   :  { %v419_v55 = vpop.eup %418 }
 0x12d   :  { %358 = vmatmul.mubr.f32.vlgmr.msra.gmra.mrb[0].mxu1 %v419_v55 }
 0x200   :  { %v229_v57 = vpop.f32.mrb[0].mxu1 }
 0x201   :  { %v230_v58 = vadd.f32 %v255_v56, %v229_v57  ;;  %v359_v59 = vpop.f32.mrb[1].mxu1 }
 0x203   :  { %420 = vtanh.f32 %v230_v58 }
 0x20d   :  { %v421_v60 = vpop.eup %420 }
 0x20e   :  { %234 = vst [vmem:[#allocation7] sm:$0xff] %v421_v60 }
 0x20f   :  { %239 = vsyncadd [#allocation4], 64  ;;  %s503_s16 = smov [#allocation7]  }
 0x210   :  { %s240_s17 = sshll.u32 %s503_s16, 4  ;;  %s241_s17 = int_to_ptr.vmem [resolvable:$true] %s240_s17 }
 0x211   :  { %s466_s18 = scalar_lea.vmem %s241_s17, 64  ;;  %s470_s19 = scalar_lea.vmem %s241_s17, 128 }
 0x212   :  { %p467_p2 = scmp.ne.s32.totalorder %s241_s17, %s466_s18  ;;  %p471_p3 = scmp.lt.s32.totalorder %s241_s17, %s241_s17 }
 0x213   :  { %p472_p4 = scmp.lt.s32.totalorder %s470_s19, %s466_s18 }
 0x215   :  { %p473_p5 = por %p472_p4, %p471_p3 }
 0x217   :  { %p474_p6 = pnand %p473_p5, %p467_p2 }
 0x219   :  { %477 = shalt.err (!%p474_p6)
}
 0x21a   :  { %s478_s21 = scalar_lea.hbm %s591_s3, 64 }
 0x21b   :  { %p479_p7 = scmp.ne.s32.totalorder %s591_s3, %s478_s21  ;;  %p482_p8 = scmp.lt.u32.totalorder %s478_s21, %s591_s3 }
 0x21d   :  { %p484_p9 = pnand %p482_p8, %p479_p7 }
 0x21f   :  { %487 = shalt.err (!%p484_p9)
}
 0x220   :  { %246 = dma.vmem_to_hbm [thread:$0]  %s241_s17, 64, %s591_s3, [#allocation4], %s495_s23, %s495_s23, %s496_s24  }
 0x221   :  { %492 = dma.done.wait [#allocation4], 128  }
 0x222   :  { %493 = vsyncadd [#allocation4], 4294967168 }
 0x223   :  { %250 = vsyncpa [#allocation3], 1 }
 0x224   :  { %251 = vsyncpa [#allocation6], 1 }
 0x225   :  { %252 = vsyncpa [#allocation4], 1 }

</bundles_post_ra>
